<compile_context>
chip_gen: v6e
topology: v6e:2x2x1
jax: 0.10.0
libtpu: 0.0.40
codegen_flags: <defaults>
</compile_context>

<pallas_src>
import jax
import jax.numpy as jnp
from jax.experimental import pallas as pl
from jax.experimental.pallas import tpu as pltpu

LATENT = 20          # fc3 in_features
HIDDEN = 400         # fc3 out_features / fc4 in_features
OUT = 784            # fc4 out_features
HIDDEN_PAD = 512     # 400 padded to a lane multiple (4 * 128), internal only


def _round_up(x, m):
    return (x + m - 1) // m * m


def decoder_kernel(z_ref, w3_ref, b3_ref, w4_ref, b4_ref, out_ref):
    # fc3 + relu : bf16 operands into the MXU, f32 accumulation.
    z = z_ref[...].astype(jnp.bfloat16)
    h3 = jnp.dot(z, w3_ref[...], preferred_element_type=jnp.float32)
    h3 = jnp.maximum(h3 + b3_ref[...], 0.0)                 # (bm, 512)
    # fc4 + sigmoid (padded hidden rows of W4 are zero -> no effect).
    logits = jnp.dot(h3.astype(jnp.bfloat16), w4_ref[...],
                     preferred_element_type=jnp.float32)    # (bm, 784)
    logits = logits + b4_ref[...]
    # sigmoid(x) == 0.5 * (tanh(0.5 * x) + 1): single EUP transcendental.
    out_ref[...] = (0.5 * (jnp.tanh(0.5 * logits) + 1.0)).astype(out_ref.dtype)


def prepare_decoder_params(w3, b3, w4, b4):
    """Pad the hidden dim to a lane multiple and cast weights to bf16 (once)."""
    w3p = jnp.zeros((LATENT, HIDDEN_PAD), jnp.bfloat16)
    w3p = w3p.at[:, :HIDDEN].set(w3.astype(jnp.bfloat16))
    b3p = jnp.zeros((1, HIDDEN_PAD), jnp.float32).at[:, :HIDDEN].set(b3)
    w4p = jnp.zeros((HIDDEN_PAD, OUT), jnp.bfloat16)
    w4p = w4p.at[:HIDDEN, :].set(w4.astype(jnp.bfloat16))
    b4p = jnp.asarray(b4, jnp.float32).reshape(1, OUT)
    return w3p, b3p, w4p, b4p


def _choose_tiling(B, block_m):
    """Divisor-aware batch tiling: small padding, >=2 tiles when possible."""
    B8 = _round_up(B, 8)                  # sublane multiple first
    n_tiles = pl.cdiv(B8, block_m)
    if B8 >= 16:                          # let v7x megacore shard the grid
        n_tiles = max(n_tiles, 2)
    bm = _round_up(pl.cdiv(B8, n_tiles), 8)
    n_tiles = pl.cdiv(B8, bm)             # re-derive after rounding
    B_pad = bm * n_tiles
    return bm, B_pad, n_tiles


def decoder_forward(z, w3p, b3p, w4p, b4p, *, block_m=512,
                    out_dtype=jnp.float32):
    """z: (B, 20) f32; padded/bf16 params from prepare_decoder_params."""
    B = z.shape[0]
    bm, B_pad, n_tiles = _choose_tiling(B, block_m)
    if B_pad != B:
        z = jnp.pad(z, ((0, B_pad - B), (0, 0)))

    flops = 2 * B_pad * (LATENT * HIDDEN_PAD + HIDDEN_PAD * OUT)
    bytes_accessed = (
        B_pad * LATENT * 4                                  # z (f32)
        + w3p.size * 2 + w4p.size * 2                       # bf16 weights
        + b3p.size * 4 + b4p.size * 4                       # f32 biases
        + B_pad * OUT * jnp.dtype(out_dtype).itemsize       # output
    )

    out = pl.pallas_call(
        decoder_kernel,
        out_shape=jax.ShapeDtypeStruct((B_pad, OUT), out_dtype),
        grid_spec=pltpu.PrefetchScalarGridSpec(
            num_scalar_prefetch=0,
            grid=(n_tiles,),
            in_specs=[
                pl.BlockSpec((bm, LATENT), lambda i: (i, 0)),
                # Constant index maps -> weights DMA'd once, VMEM-resident
                # across all batch tiles.
                pl.BlockSpec((LATENT, HIDDEN_PAD), lambda i: (0, 0)),
                pl.BlockSpec((1, HIDDEN_PAD), lambda i: (0, 0)),
                pl.BlockSpec((HIDDEN_PAD, OUT), lambda i: (0, 0)),
                pl.BlockSpec((1, OUT), lambda i: (0, 0)),
            ],
            out_specs=pl.BlockSpec((bm, OUT), lambda i: (i, 0)),
        ),
        compiler_params=pltpu.CompilerParams(
            dimension_semantics=("parallel",),
        ),
        cost_estimate=pl.CostEstimate(
            flops=flops,
            transcendentals=B_pad * OUT,      # one tanh per output element
            bytes_accessed=bytes_accessed,
        ),
    )(z, w3p, b3p, w4p, b4p)

    # Row-slice only if the batch was actually padded; no column slice needed.
    if B_pad != B:
        out = out[:B]
    return out


def init_decoder_params(key):
    # Deterministic init mimicking PyTorch nn.Linear default:
    # U(-1/sqrt(fan_in), 1/sqrt(fan_in)) for both weight and bias.
    k1, k2, k3, k4 = jax.random.split(key, 4)
    lim3 = 1.0 / jnp.sqrt(float(LATENT))
    lim4 = 1.0 / jnp.sqrt(float(HIDDEN))
    w3 = jax.random.uniform(k1, (LATENT, HIDDEN), jnp.float32, -lim3, lim3)
    b3 = jax.random.uniform(k2, (1, HIDDEN), jnp.float32, -lim3, lim3)
    w4 = jax.random.uniform(k3, (HIDDEN, OUT), jnp.float32, -lim4, lim4)
    b4 = jax.random.uniform(k4, (1, OUT), jnp.float32, -lim4, lim4)
    return w3, b3, w4, b4


def decoder_reference(z, w3, b3, w4, b4):
    h3 = jnp.maximum(z @ w3 + b3, 0.0)
    return jax.nn.sigmoid(h3 @ w4 + b4)


if __name__ == "__main__":
    key = jax.random.PRNGKey(0)
    kz, kp = jax.random.split(key)

    B = 8                                                 # small batch
    z = jax.random.normal(kz, (B, LATENT), jnp.float32)   # latent dim 20
    w3, b3, w4, b4 = init_decoder_params(kp)
    w3p, b3p, w4p, b4p = prepare_decoder_params(w3, b3, w4, b4)

    out = decoder_forward(z, w3p, b3p, w4p, b4p)
    out = jax.block_until_ready(out)

    ref = decoder_reference(z, w3, b3, w4, b4)
    assert out.shape == (B, OUT)
    # bf16 weight streaming -> tolerance loosened vs. the f32 reference.
    assert jnp.allclose(out, ref, atol=2e-2, rtol=2e-2), (
        float(jnp.max(jnp.abs(out - ref))))

    print("KERNEL_OK")
</pallas_src>

<mosaic_0001>
module attributes {stable_mosaic.version = 11 : i64} {
  func.func @decoder_kernel(%arg0: i32, %arg1: memref<8x20xf32, #tpu.memory_space<vmem>>, %arg2: memref<20x512xbf16, #tpu.memory_space<vmem>>, %arg3: memref<1x512xf32, #tpu.memory_space<vmem>>, %arg4: memref<512x784xbf16, #tpu.memory_space<vmem>>, %arg5: memref<1x784xf32, #tpu.memory_space<vmem>>, %arg6: memref<8x784xf32, #tpu.memory_space<vmem>>) attributes {dimension_semantics = [#tpu.dimension_semantics<parallel>], iteration_bounds = array<i64: 1>, scalar_prefetch = 0 : i64, scratch_operands = 0 : i64, tpu.core_type = #tpu.core_type<tc>, window_params = [{transform_indices = @transform_0, window_bounds = array<i64: 8, 20>}, {pipeline_mode = #tpu.pipeline_mode<synchronous>, transform_indices = @transform_1, window_bounds = array<i64: 20, 512>}, {pipeline_mode = #tpu.pipeline_mode<synchronous>, transform_indices = @transform_2, window_bounds = array<i64: 1, 512>}, {pipeline_mode = #tpu.pipeline_mode<synchronous>, transform_indices = @transform_3, window_bounds = array<i64: 512, 784>}, {pipeline_mode = #tpu.pipeline_mode<synchronous>, transform_indices = @transform_4, window_bounds = array<i64: 1, 784>}, {transform_indices = @transform_5, window_bounds = array<i64: 8, 784>}]} {
    %c0 = arith.constant 0 : index
    %c0_0 = arith.constant 0 : index
    %0 = vector.load %arg1[%c0, %c0_0] : memref<8x20xf32, #tpu.memory_space<vmem>>, vector<8x20xf32>
    %1 = arith.truncf %0 : vector<8x20xf32> to vector<8x20xbf16>
    %c0_1 = arith.constant 0 : index
    %c0_2 = arith.constant 0 : index
    %2 = vector.load %arg2[%c0_1, %c0_2] : memref<20x512xbf16, #tpu.memory_space<vmem>>, vector<20x512xbf16>
    %cst = arith.constant dense<0.000000e+00> : vector<8x512xf32>
    %3 = tpu.matmul %1, %2, %cst {dimension_numbers = #tpu.dot_dimension_numbers<[1], [0], [0], [1], [0, 0, 1, 1], [], []>} : vector<8x20xbf16>, vector<20x512xbf16>, vector<8x512xf32> -> vector<8x512xf32>
    %c0_3 = arith.constant 0 : index
    %c0_4 = arith.constant 0 : index
    %4 = vector.load %arg3[%c0_3, %c0_4] : memref<1x512xf32, #tpu.memory_space<vmem>>, vector<1x512xf32>
    %5 = vector.broadcast %4 : vector<1x512xf32> to vector<8x512xf32>
    %6 = arith.addf %3, %5 : vector<8x512xf32>
    %cst_5 = arith.constant 0.000000e+00 : f32
    %7 = vector.broadcast %cst_5 : f32 to vector<8x512xf32>
    %8 = arith.maximumf %6, %7 : vector<8x512xf32>
    %9 = arith.truncf %8 : vector<8x512xf32> to vector<8x512xbf16>
    %c0_6 = arith.constant 0 : index
    %c0_7 = arith.constant 0 : index
    %10 = vector.load %arg4[%c0_6, %c0_7] : memref<512x784xbf16, #tpu.memory_space<vmem>>, vector<512x784xbf16>
    %cst_8 = arith.constant dense<0.000000e+00> : vector<8x784xf32>
    %11 = tpu.matmul %9, %10, %cst_8 {dimension_numbers = #tpu.dot_dimension_numbers<[1], [0], [0], [1], [0, 0, 1, 1], [], []>} : vector<8x512xbf16>, vector<512x784xbf16>, vector<8x784xf32> -> vector<8x784xf32>
    %c0_9 = arith.constant 0 : index
    %c0_10 = arith.constant 0 : index
    %12 = vector.load %arg5[%c0_9, %c0_10] : memref<1x784xf32, #tpu.memory_space<vmem>>, vector<1x784xf32>
    %13 = vector.broadcast %12 : vector<1x784xf32> to vector<8x784xf32>
    %14 = arith.addf %11, %13 : vector<8x784xf32>
    %cst_11 = arith.constant 5.000000e-01 : f32
    %15 = vector.broadcast %cst_11 : f32 to vector<8x784xf32>
    %16 = arith.mulf %15, %14 : vector<8x784xf32>
    %17 = math.tanh %16 : vector<8x784xf32>
    %cst_12 = arith.constant 1.000000e+00 : f32
    %18 = vector.broadcast %cst_12 : f32 to vector<8x784xf32>
    %19 = arith.addf %17, %18 : vector<8x784xf32>
    %cst_13 = arith.constant 5.000000e-01 : f32
    %20 = vector.broadcast %cst_13 : f32 to vector<8x784xf32>
    %21 = arith.mulf %20, %19 : vector<8x784xf32>
    %c0_14 = arith.constant 0 : index
    %c0_15 = arith.constant 0 : index
    %22 = vector.load %arg6[%c0_14, %c0_15] : memref<8x784xf32, #tpu.memory_space<vmem>>, vector<8x784xf32>
    tpu.vector_store %arg6[%c0_14, %c0_15], %21 {strides = array<i32>} : memref<8x784xf32, #tpu.memory_space<vmem>>, vector<8x784xf32>,
    return
  }
  func.func @transform_0(%arg0: i32) -> (i32, i32) {
    %c0_i32 = arith.constant 0 : i32
    %c0_i32_0 = arith.constant 0 : i32
    return %arg0, %c0_i32 : i32, i32
  }
  func.func @transform_1(%arg0: i32) -> (i32, i32) {
    %c0_i32 = arith.constant 0 : i32
    %c0_i32_0 = arith.constant 0 : i32
    %c0_i32_1 = arith.constant 0 : i32
    return %c0_i32, %c0_i32_0 : i32, i32
  }
  func.func @transform_2(%arg0: i32) -> (i32, i32) {
    %c0_i32 = arith.constant 0 : i32
    %c0_i32_0 = arith.constant 0 : i32
    %c0_i32_1 = arith.constant 0 : i32
    return %c0_i32, %c0_i32_0 : i32, i32
  }
  func.func @transform_3(%arg0: i32) -> (i32, i32) {
    %c0_i32 = arith.constant 0 : i32
    %c0_i32_0 = arith.constant 0 : i32
    %c0_i32_1 = arith.constant 0 : i32
    return %c0_i32, %c0_i32_0 : i32, i32
  }
  func.func @transform_4(%arg0: i32) -> (i32, i32) {
    %c0_i32 = arith.constant 0 : i32
    %c0_i32_0 = arith.constant 0 : i32
    %c0_i32_1 = arith.constant 0 : i32
    return %c0_i32, %c0_i32_0 : i32, i32
  }
  func.func @transform_5(%arg0: i32) -> (i32, i32) {
    %c0_i32 = arith.constant 0 : i32
    %c0_i32_0 = arith.constant 0 : i32
    return %arg0, %c0_i32 : i32, i32
  }
}

</mosaic_0001>

<bundles_post_ra>
// kernel: tpu_custom_call.1
= control target key start
LH: loop header
LB: loop body
LE: loop exit
PB: predicated region body
PF: predicated region fallthrough
CT: control target
= control target key end

     0   :  { %vm86_vm0 = vcmask 1041408   ;;  %v2658_v14 = vmov 0   ;;  %vm82_vm1 = vcmask 162816   ;;  %s3450_s0 = inlined_call_operand.vmem [shape: f32[8,20], index: 0, kind: input, shape index: {}]   ;;  %s3451_s1 = inlined_call_operand.vmem [shape: bf16[20,512], index: 1, kind: input, shape index: {}]   ;;  %s3452_s2 = inlined_call_operand.vmem [shape: f32[1,512], index: 2, kind: input, shape index: {}]   ;;  %s3453_s3 = inlined_call_operand.vmem [shape: bf16[512,784], index: 3, kind: input, shape index: {}]   ;;  %s3454_s4 = inlined_call_operand.vmem [shape: f32[1,784], index: 4, kind: input, shape index: {}]   ;;  %s3455_s5 = inlined_call_operand.hbm [shape: f32[8,784], index: 5, kind: output, shape index: {}]  }
   0x1   :  { %v28_v0 = vld [vmem:[%s3451_s1 + $0x20] sm:$0x33]  ;;  %v29_v1 = vld [vmem:[%s3451_s1 + $0x28] sm:$0x33]  ;;  %131 = vmatprep.mubr.bf16.mxu0 %v2658_v14  ;;  %172 = vmatprep.mubr.bf16.mxu1 %v2658_v14  ;;  %v2310_v19 = vld [vmem:[%s3453_s3 + $0x154] ss:$28 sps:$4 sm:$0xff]  }
   0x2   :  { %v2015_v2 = vcombine.high %v28_v0, %v28_v0  ;;  %v2017_v3 = vcombine.high %v29_v1, %v29_v1  ;;  %v2014_v4 = vcombine.low %v28_v0, %v28_v0  ;;  %v2016_v5 = vcombine.low %v29_v1, %v29_v1  ;;  %v2296_v6 = vld [vmem:[%s3451_s1 + $0x4] ss:$16 sps:$4 sm:$0xff]   ;;  %v2298_v7 = vld [vmem:[%s3451_s1 + $0xc] ss:$16 sps:$4 sm:$0xff]   ;;  %v2300_v8 = vld [vmem:[%s3451_s1] ss:$16 sps:$4 sm:$0xff]  }
   0x3   :  { %v2301_v11 = vld [vmem:[%s3451_s1 + $0x8] ss:$16 sps:$4 sm:$0xff]   ;;  %v22_v12 = vld [vmem:[%s3450_s0] sm:$0xff]  ;;  %v2313_v20 = vld [vmem:[%s3453_s3 + $0x4d4] ss:$28 sps:$4 sm:$0xff]  }
   0x4   :  { %2018 = vmatprep.subr.msk.bf16.mxu0 %vm86_vm0, %v2015_v2  ;;  %2020 = vmatprep.subr.msk.bf16.mxu1 %vm86_vm0, %v2017_v3  ;;  %v88_v9 = vsel %vm86_vm0, %v2014_v4, 0  ;;  %v94_v10 = vsel %vm86_vm0, %v2016_v5, 0  ;;  %v2304_v13 = vld [vmem:[%s3453_s3 + $0x18c] ss:$28 sps:$4 sm:$0xff]   ;;  %v23_v16 = vpack.c.bf16 %v22_v12, %v22_v12  ;;  %v2316_v23 = vld [vmem:[%s3453_s3 + $0x11c] ss:$28 sps:$4 sm:$0xff]  }
   0x5   :  { %112 = vmatpush1.bf16.msra.mxu0 %v88_v9  ;;  %153 = vmatpush1.bf16.msra.mxu1 %v94_v10  ;;  %v2307_v15 = vld [vmem:[%s3453_s3 + $0x50c] ss:$28 sps:$4 sm:$0xff]   ;;  %v2319_v24 = vld [vmem:[%s3453_s3 + $0x49c] ss:$28 sps:$4 sm:$0xff]   ;;  %v2322_v27 = vld [vmem:[%s3453_s3 + $0xe4] ss:$28 sps:$4 sm:$0xff]  }
   0x6   :  { %113 = vmatprep.subr.bf16.mxu0 %v2296_v6  ;;  %154 = vmatprep.subr.bf16.mxu1 %v2298_v7  ;;  %v2302_v17 = vld [vmem:[%s3453_s3 + $0x188] ss:$28 sps:$4 sm:$0xff]   ;;  %v2308_v21 = vld [vmem:[%s3453_s3 + $0x150] ss:$28 sps:$4 sm:$0xff]   ;;  %v2314_v25 = vld [vmem:[%s3453_s3 + $0x118] ss:$28 sps:$4 sm:$0xff]  }
   0x7   :  { %v2305_v18 = vld [vmem:[%s3453_s3 + $0x508] ss:$28 sps:$4 sm:$0xff]   ;;  %v2311_v22 = vld [vmem:[%s3453_s3 + $0x4d0] ss:$28 sps:$4 sm:$0xff]   ;;  %v2317_v26 = vld [vmem:[%s3453_s3 + $0x498] ss:$28 sps:$4 sm:$0xff]  }
   0x8   :  { %v2325_v28 = vld [vmem:[%s3453_s3 + $0x464] ss:$28 sps:$4 sm:$0xff]   ;;  %v2328_v31 = vld [vmem:[%s3453_s3 + $0xac] ss:$28 sps:$4 sm:$0xff]   ;;  %v2334_v35 = vld [vmem:[%s3453_s3 + $0x74] ss:$28 sps:$4 sm:$0xff]  }
   0x9   :  { %114 = vmatpush1.bf16.msra.mxu0 %v2300_v8  ;;  %155 = vmatpush1.bf16.msra.mxu1 %v2301_v11  ;;  %v2320_v29 = vld [vmem:[%s3453_s3 + $0xe0] ss:$28 sps:$4 sm:$0xff]   ;;  %v2331_v32 = vld [vmem:[%s3453_s3 + $0x42c] ss:$28 sps:$4 sm:$0xff]   ;;  %v2337_v36 = vld [vmem:[%s3453_s3 + $0x3f4] ss:$28 sps:$4 sm:$0xff]  }
   0xa   :  { %1634 = vmatprep.subr.bf16.mxu0 %v2304_v13  ;;  %1675 = vmatprep.subr.bf16.mxu1 %v2307_v15  ;;  %v2323_v30 = vld [vmem:[%s3453_s3 + $0x460] ss:$28 sps:$4 sm:$0xff]   ;;  %v2326_v33 = vld [vmem:[%s3453_s3 + $0xa8] ss:$28 sps:$4 sm:$0xff]   ;;  %v2332_v37 = vld [vmem:[%s3453_s3 + $0x70] ss:$28 sps:$4 sm:$0xff]  }
   0xb   :  { %v2329_v34 = vld [vmem:[%s3453_s3 + $0x428] ss:$28 sps:$4 sm:$0xff]   ;;  %v2335_v38 = vld [vmem:[%s3453_s3 + $0x3f0] ss:$28 sps:$4 sm:$0xff]   ;;  %v2340_v39 = vld [vmem:[%s3453_s3 + $0x3c] ss:$28 sps:$4 sm:$0xff]  }
   0xc   :  { %2019 = vmatmul.mubr.msk.bf16.vlgmr.msra.gmra.mxu0 %vm82_vm1, %v23_v16  ;;  %2021 = vmatmul.mubr.msk.bf16.vlgmr.msra.gmra.mxu1 %vm82_vm1, %v23_v16  ;;  %v2343_v40 = vld [vmem:[%s3453_s3 + $0x3bc] ss:$28 sps:$4 sm:$0xff]   ;;  %v2346_v43 = vld [vmem:[%s3453_s3 + $0x4] ss:$28 sps:$4 sm:$0xff]   ;;  %v2352_v47 = vld [vmem:[%s3453_s3 + $0x34c] ss:$28 sps:$4 sm:$0xff]  }
   0xd   :  { %1635 = vmatpush1.bf16.msra.mxu0 %v2302_v17  ;;  %1676 = vmatpush1.bf16.msra.mxu1 %v2305_v18  ;;  %v2338_v41 = vld [vmem:[%s3453_s3 + $0x38] ss:$28 sps:$4 sm:$0xff]   ;;  %v2349_v44 = vld [vmem:[%s3453_s3 + $0x384] ss:$28 sps:$4 sm:$0xff]   ;;  %v2355_v48 = vld [vmem:[%s3453_s3 + $0x6cc] ss:$28 sps:$4 sm:$0xff]  }
   0xe   :  { %1636 = vmatprep.subr.bf16.mxu0 %v2310_v19  ;;  %1677 = vmatprep.subr.bf16.mxu1 %v2313_v20  ;;  %v2341_v42 = vld [vmem:[%s3453_s3 + $0x3b8] ss:$28 sps:$4 sm:$0xff]   ;;  %v2344_v45 = vld [vmem:[%s3453_s3] ss:$28 sps:$4 sm:$0xff]   ;;  %v2350_v49 = vld [vmem:[%s3453_s3 + $0x348] ss:$28 sps:$4 sm:$0xff]  }
   0xf   :  { %v2347_v46 = vld [vmem:[%s3453_s3 + $0x380] ss:$28 sps:$4 sm:$0xff]   ;;  %v2353_v50 = vld [vmem:[%s3453_s3 + $0x6c8] ss:$28 sps:$4 sm:$0xff]   ;;  %v2358_v51 = vld [vmem:[%s3453_s3 + $0x314] ss:$28 sps:$4 sm:$0xff]  }
  0x10   :  { %v2361_v52 = vld [vmem:[%s3453_s3 + $0x694] ss:$28 sps:$4 sm:$0xff]   ;;  %v2364_v55 = vld [vmem:[%s3453_s3 + $0x2dc] ss:$28 sps:$4 sm:$0xff]   ;;  %v2370_v59 = vld [vmem:[%s3453_s3 + $0x2a4] ss:$28 sps:$4 sm:$0xff]  }
  0x11   :  { %1637 = vmatpush1.bf16.msra.mxu0 %v2308_v21  ;;  %1678 = vmatpush1.bf16.msra.mxu1 %v2311_v22  ;;  %v2356_v53 = vld [vmem:[%s3453_s3 + $0x310] ss:$28 sps:$4 sm:$0xff]   ;;  %v2367_v56 = vld [vmem:[%s3453_s3 + $0x65c] ss:$28 sps:$4 sm:$0xff]   ;;  %v2373_v60 = vld [vmem:[%s3453_s3 + $0x624] ss:$28 sps:$4 sm:$0xff]  }
  0x12   :  { %1638 = vmatprep.subr.bf16.mxu0 %v2316_v23  ;;  %1679 = vmatprep.subr.bf16.mxu1 %v2319_v24  ;;  %v2359_v54 = vld [vmem:[%s3453_s3 + $0x690] ss:$28 sps:$4 sm:$0xff]   ;;  %v2362_v57 = vld [vmem:[%s3453_s3 + $0x2d8] ss:$28 sps:$4 sm:$0xff]   ;;  %v2368_v61 = vld [vmem:[%s3453_s3 + $0x2a0] ss:$28 sps:$4 sm:$0xff]  }
  0x13   :  { %v2365_v58 = vld [vmem:[%s3453_s3 + $0x658] ss:$28 sps:$4 sm:$0xff]   ;;  %v2371_v62 = vld [vmem:[%s3453_s3 + $0x620] ss:$28 sps:$4 sm:$0xff]   ;;  %v2376_v63 = vld [vmem:[%s3453_s3 + $0x26c] ss:$28 sps:$4 sm:$0xff]  }
  0x14   :  { %v2379_v0 = vld [vmem:[%s3453_s3 + $0x5ec] ss:$28 sps:$4 sm:$0xff]   ;;  %v2382_v3 = vld [vmem:[%s3453_s3 + $0x234] ss:$28 sps:$4 sm:$0xff]   ;;  %v2388_v7 = vld [vmem:[%s3453_s3 + $0x1fc] ss:$28 sps:$4 sm:$0xff]  }
  0x15   :  { %1639 = vmatpush1.bf16.msra.mxu0 %v2314_v25  ;;  %1680 = vmatpush1.bf16.msra.mxu1 %v2317_v26  ;;  %v2374_v1 = vld [vmem:[%s3453_s3 + $0x268] ss:$28 sps:$4 sm:$0xff]   ;;  %v2385_v4 = vld [vmem:[%s3453_s3 + $0x5b4] ss:$28 sps:$4 sm:$0xff]   ;;  %v2391_v8 = vld [vmem:[%s3453_s3 + $0x57c] ss:$28 sps:$4 sm:$0xff]  }
  0x16   :  { %1640 = vmatprep.subr.bf16.mxu0 %v2322_v27  ;;  %1681 = vmatprep.subr.bf16.mxu1 %v2325_v28  ;;  %v2377_v2 = vld [vmem:[%s3453_s3 + $0x5e8] ss:$28 sps:$4 sm:$0xff]   ;;  %v2380_v5 = vld [vmem:[%s3453_s3 + $0x230] ss:$28 sps:$4 sm:$0xff]   ;;  %v2386_v9 = vld [vmem:[%s3453_s3 + $0x1f8] ss:$28 sps:$4 sm:$0xff]  }
  0x17   :  { %v2383_v6 = vld [vmem:[%s3453_s3 + $0x5b0] ss:$28 sps:$4 sm:$0xff]   ;;  %v2389_v10 = vld [vmem:[%s3453_s3 + $0x578] ss:$28 sps:$4 sm:$0xff]   ;;  %v2394_v11 = vld [vmem:[%s3453_s3 + $0x1c4] ss:$28 sps:$4 sm:$0xff]  }
  0x18   :  { %v2397_v12 = vld [vmem:[%s3453_s3 + $0x544] ss:$28 sps:$4 sm:$0xff]   ;;  %v2400_v15 = vld [vmem:[%s3453_s3 + $0x194] ss:$28 sps:$4 sm:$0xff]  }
  0x19   :  { %1641 = vmatpush1.bf16.msra.mxu0 %v2320_v29  ;;  %1682 = vmatpush1.bf16.msra.mxu1 %v2323_v30  ;;  %v2392_v13 = vld [vmem:[%s3453_s3 + $0x1c0] ss:$28 sps:$4 sm:$0xff]   ;;  %v2403_v16 = vld [vmem:[%s3453_s3 + $0x514] ss:$28 sps:$4 sm:$0xff]  }
  0x1a   :  { %1642 = vmatprep.subr.bf16.mxu0 %v2328_v31  ;;  %1683 = vmatprep.subr.bf16.mxu1 %v2331_v32  ;;  %v2395_v14 = vld [vmem:[%s3453_s3 + $0x540] ss:$28 sps:$4 sm:$0xff]  }
  0x1d   :  { %1643 = vmatpush1.bf16.msra.mxu0 %v2326_v33  ;;  %1684 = vmatpush1.bf16.msra.mxu1 %v2329_v34 }
  0x1e   :  { %1644 = vmatprep.subr.bf16.mxu0 %v2334_v35  ;;  %1685 = vmatprep.subr.bf16.mxu1 %v2337_v36 }
  0x21   :  { %1645 = vmatpush1.bf16.msra.mxu0 %v2332_v37  ;;  %1686 = vmatpush1.bf16.msra.mxu1 %v2335_v38 }
  0x22   :  { %1646 = vmatprep.subr.bf16.mxu0 %v2340_v39  ;;  %1687 = vmatprep.subr.bf16.mxu1 %v2343_v40 }
  0x25   :  { %1647 = vmatpush1.bf16.msra.mxu0 %v2338_v41  ;;  %1688 = vmatpush1.bf16.msra.mxu1 %v2341_v42 }
  0x26   :  { %1648 = vmatprep.subr.bf16.mxu0 %v2346_v43  ;;  %1689 = vmatprep.subr.bf16.mxu1 %v2349_v44 }
  0x29   :  { %1649 = vmatpush1.bf16.msra.mxu0 %v2344_v45  ;;  %1690 = vmatpush1.bf16.msra.mxu1 %v2347_v46 }
  0x2a   :  { %1650 = vmatprep.subr.bf16.mxu0 %v2352_v47  ;;  %1691 = vmatprep.subr.bf16.mxu1 %v2355_v48 }
  0x2d   :  { %1651 = vmatpush2.bf16.msra.mxu0 %v2350_v49  ;;  %1692 = vmatpush2.bf16.msra.mxu1 %v2353_v50 }
  0x2e   :  { %1652 = vmatprep.subr.bf16.mxu0 %v2358_v51  ;;  %1693 = vmatprep.subr.bf16.mxu1 %v2361_v52 }
  0x31   :  { %1653 = vmatpush2.bf16.msra.mxu0 %v2356_v53  ;;  %1694 = vmatpush2.bf16.msra.mxu1 %v2359_v54 }
  0x32   :  { %1654 = vmatprep.subr.bf16.mxu0 %v2364_v55  ;;  %1695 = vmatprep.subr.bf16.mxu1 %v2367_v56 }
  0x35   :  { %1655 = vmatpush2.bf16.msra.mxu0 %v2362_v57  ;;  %1696 = vmatpush2.bf16.msra.mxu1 %v2365_v58 }
  0x36   :  { %1656 = vmatprep.subr.bf16.mxu0 %v2370_v59  ;;  %1697 = vmatprep.subr.bf16.mxu1 %v2373_v60 }
  0x39   :  { %1657 = vmatpush2.bf16.msra.mxu0 %v2368_v61  ;;  %1698 = vmatpush2.bf16.msra.mxu1 %v2371_v62 }
  0x3a   :  { %1658 = vmatprep.subr.bf16.mxu0 %v2376_v63  ;;  %1699 = vmatprep.subr.bf16.mxu1 %v2379_v0 }
  0x3d   :  { %1659 = vmatpush2.bf16.msra.mxu0 %v2374_v1  ;;  %1700 = vmatpush2.bf16.msra.mxu1 %v2377_v2 }
  0x3e   :  { %1660 = vmatprep.subr.bf16.mxu0 %v2382_v3  ;;  %1701 = vmatprep.subr.bf16.mxu1 %v2385_v4 }
  0x41   :  { %1661 = vmatpush2.bf16.msra.mxu0 %v2380_v5  ;;  %1702 = vmatpush2.bf16.msra.mxu1 %v2383_v6 }
  0x42   :  { %1662 = vmatprep.subr.bf16.mxu0 %v2388_v7  ;;  %1703 = vmatprep.subr.bf16.mxu1 %v2391_v8 }
  0x45   :  { %1663 = vmatpush2.bf16.msra.mxu0 %v2386_v9  ;;  %1704 = vmatpush2.bf16.msra.mxu1 %v2389_v10 }
  0x46   :  { %1664 = vmatprep.subr.bf16.mxu0 %v2394_v11  ;;  %1705 = vmatprep.subr.bf16.mxu1 %v2397_v12 }
  0x49   :  { %1665 = vmatpush2.bf16.msra.mxu0 %v2392_v13  ;;  %1706 = vmatpush2.bf16.msra.mxu1 %v2395_v14 }
  0x4a   :  { %1716 = vmatprep.subr.bf16.mxu0 %v2400_v15  ;;  %1757 = vmatprep.subr.bf16.mxu1 %v2403_v16 }
  0x4b   :  { %10 = vsyncpa [#allocation3], 0  ;;  %v32_v17 = vlaneseq  ;;  %v30_v21 = vld [vmem:[%s3452_s2] sm:$0xf]  ;;  %v2398_v47 = vld [vmem:[%s3453_s3 + $0x190] ss:$28 sps:$4 sm:$0xff]  }
  0x4c   :  { %v2401_v48 = vld [vmem:[%s3453_s3 + $0x510] ss:$28 sps:$4 sm:$0xff]   ;;  %v2406_v50 = vld [vmem:[%s3453_s3 + $0x15c] ss:$28 sps:$4 sm:$0xff]   ;;  %v2412_v54 = vld [vmem:[%s3453_s3 + $0x124] ss:$28 sps:$4 sm:$0xff]  }
  0x4d   :  { %v2909_v18 = vshrl.u32 %v32_v17, 7  ;;  %v2409_v51 = vld [vmem:[%s3453_s3 + $0x4dc] ss:$28 sps:$4 sm:$0xff]   ;;  %v2415_v55 = vld [vmem:[%s3453_s3 + $0x4a4] ss:$28 sps:$4 sm:$0xff]   ;;  %vm1994_vm2 = vcmask 130048  }
  0x4e   :  { %v2404_v52 = vld [vmem:[%s3453_s3 + $0x158] ss:$28 sps:$4 sm:$0xff]   ;;  %v2410_v56 = vld [vmem:[%s3453_s3 + $0x120] ss:$28 sps:$4 sm:$0xff]   ;;  %v2418_v58 = vld [vmem:[%s3453_s3 + $0xec] ss:$28 sps:$4 sm:$0xff]  }
  0x4f   :  { %v34_v19 = vsub.s32 0, %v2909_v18  ;;  %v42_v20 = vsub.s32 2, %v2909_v18  ;;  %v38_v22 = vsub.s32 1, %v2909_v18  ;;  %v46_v23 = vsub.s32 3, %v2909_v18  ;;  %v2407_v53 = vld [vmem:[%s3453_s3 + $0x4d8] ss:$28 sps:$4 sm:$0xff]  }
  0x50   :  { %v2413_v57 = vld [vmem:[%s3453_s3 + $0x4a0] ss:$28 sps:$4 sm:$0xff]   ;;  %v2421_v59 = vld [vmem:[%s3453_s3 + $0x46c] ss:$28 sps:$4 sm:$0xff]   ;;  %v2424_v62 = vld [vmem:[%s3453_s3 + $0xb4] ss:$28 sps:$4 sm:$0xff]  }
  0x51   :  { %v35_v24 = vrot.slane %v30_v21, %v34_v19  ;;  %v43_v25 = vrot.slane %v30_v21, %v42_v20  ;;  %v39_v26 = vrot.slane %v30_v21, %v38_v22  ;;  %v47_v27 = vrot.slane %v30_v21, %v46_v23  ;;  %v2416_v60 = vld [vmem:[%s3453_s3 + $0xe8] ss:$28 sps:$4 sm:$0xff]   ;;  %v2427_v63 = vld [vmem:[%s3453_s3 + $0x434] ss:$28 sps:$4 sm:$0xff]   ;;  %v2430_v2 = vld [vmem:[%s3453_s3 + $0x7c] ss:$28 sps:$4 sm:$0xff]  }
  0x52   :  { %v2419_v61 = vld [vmem:[%s3453_s3 + $0x468] ss:$28 sps:$4 sm:$0xff]   ;;  %v2422_v0 = vld [vmem:[%s3453_s3 + $0xb0] ss:$28 sps:$4 sm:$0xff]   ;;  %v2433_v3 = vld [vmem:[%s3453_s3 + $0x3fc] ss:$28 sps:$4 sm:$0xff]  }
  0x53   :  { %v2425_v1 = vld [vmem:[%s3453_s3 + $0x430] ss:$28 sps:$4 sm:$0xff]   ;;  %v2428_v4 = vld [vmem:[%s3453_s3 + $0x78] ss:$28 sps:$4 sm:$0xff]   ;;  %v2436_v6 = vld [vmem:[%s3453_s3 + $0x44] ss:$28 sps:$4 sm:$0xff]  }
  0x54   :  { %v2431_v5 = vld [vmem:[%s3453_s3 + $0x3f8] ss:$28 sps:$4 sm:$0xff]   ;;  %v2439_v7 = vld [vmem:[%s3453_s3 + $0x3c4] ss:$28 sps:$4 sm:$0xff]   ;;  %v2442_v10 = vld [vmem:[%s3453_s3 + $0xc] ss:$28 sps:$4 sm:$0xff]  }
  0x55   :  { %v2434_v8 = vld [vmem:[%s3453_s3 + $0x40] ss:$28 sps:$4 sm:$0xff]   ;;  %v2445_v11 = vld [vmem:[%s3453_s3 + $0x38c] ss:$28 sps:$4 sm:$0xff]   ;;  %v2448_v14 = vld [vmem:[%s3453_s3 + $0x354] ss:$28 sps:$4 sm:$0xff]  }
  0x56   :  { %v2437_v9 = vld [vmem:[%s3453_s3 + $0x3c0] ss:$28 sps:$4 sm:$0xff]   ;;  %v2440_v12 = vld [vmem:[%s3453_s3 + $0x8] ss:$28 sps:$4 sm:$0xff]   ;;  %v2451_v15 = vld [vmem:[%s3453_s3 + $0x6d4] ss:$28 sps:$4 sm:$0xff]  }
  0x57   :  { %v2443_v13 = vld [vmem:[%s3453_s3 + $0x388] ss:$28 sps:$4 sm:$0xff]   ;;  %v2446_v16 = vld [vmem:[%s3453_s3 + $0x350] ss:$28 sps:$4 sm:$0xff]   ;;  %v2454_v21 = vld [vmem:[%s3453_s3 + $0x31c] ss:$28 sps:$4 sm:$0xff]  }
  0x58   :  { %v2449_v17 = vld [vmem:[%s3453_s3 + $0x6d0] ss:$28 sps:$4 sm:$0xff]  }
  0xcc   :  { %v133_v28 = vpop.f32.mrf.mxu0  ;;  %v174_v29 = vpop.f32.mrf.mxu1 }
  0xcd   :  { %v134_v30 = vadd.f32 %v133_v28, %v35_v24  ;;  %v175_v31 = vadd.f32 %v174_v29, %v43_v25  ;;  %v2457_v24 = vld [vmem:[%s3453_s3 + $0x69c] ss:$28 sps:$4 sm:$0xff]   ;;  %v2463_v28 = vld [vmem:[%s3453_s3 + $0x664] ss:$28 sps:$4 sm:$0xff]  }
  0xce   :  { %v135_v32 = vpop.f32.mrf.mxu0  ;;  %v176_v33 = vpop.f32.mrf.mxu1  ;;  %v2452_v25 = vld [vmem:[%s3453_s3 + $0x318] ss:$28 sps:$4 sm:$0xff]   ;;  %v2458_v29 = vld [vmem:[%s3453_s3 + $0x2e0] ss:$28 sps:$4 sm:$0xff]  }
  0xcf   :  { %v183_v34 = vmax.f32 %v175_v31, 0.0  ;;  %v136_v35 = vadd.f32 %v135_v32, %v39_v26  ;;  %v177_v36 = vadd.f32 %v176_v33, %v47_v27  ;;  %v181_v37 = vmax.f32 %v134_v30, 0.0  ;;  %v2455_v26 = vld [vmem:[%s3453_s3 + $0x698] ss:$28 sps:$4 sm:$0xff]   ;;  %v2460_v27 = vld [vmem:[%s3453_s3 + $0x2e4] ss:$28 sps:$4 sm:$0xff]  }
  0xd0   :  { %v137_v38 = vpop.f32.mrf.mxu0  ;;  %v178_v39 = vpop.f32.mrf.mxu1  ;;  %v2461_v30 = vld [vmem:[%s3453_s3 + $0x660] ss:$28 sps:$4 sm:$0xff]   ;;  %v2466_v31 = vld [vmem:[%s3453_s3 + $0x2ac] ss:$28 sps:$4 sm:$0xff]  }
  0xd1   :  { %v182_v40 = vmax.f32 %v136_v35, 0.0  ;;  %v184_v41 = vmax.f32 %v177_v36, 0.0  ;;  %v2926_v42 = vpack.c.bf16 %v183_v34, %v183_v34  ;;  %v2938_v49 = vpack.c.bf16 %v181_v37, %v181_v37  ;;  %v2469_v32 = vld [vmem:[%s3453_s3 + $0x62c] ss:$28 sps:$4 sm:$0xff]   ;;  %v2472_v35 = vld [vmem:[%s3453_s3 + $0x274] ss:$28 sps:$4 sm:$0xff]  }
  0xd2   :  { %v138_v43 = vpop.f32.mrf.mxu0  ;;  %v179_v44 = vpop.f32.mrf.mxu1  ;;  %v2464_v33 = vld [vmem:[%s3453_s3 + $0x2a8] ss:$28 sps:$4 sm:$0xff]   ;;  %v2475_v36 = vld [vmem:[%s3453_s3 + $0x5f4] ss:$28 sps:$4 sm:$0xff]   ;;  %v2478_v39 = vld [vmem:[%s3453_s3 + $0x23c] ss:$28 sps:$4 sm:$0xff]  }
  0xd3   :  { %v2928_v45 = vpack.c.bf16 %v182_v40, %v182_v40  ;;  %v2930_v46 = vpack.c.bf16 %v184_v41, %v184_v41  ;;  %v2467_v34 = vld [vmem:[%s3453_s3 + $0x628] ss:$28 sps:$4 sm:$0xff]   ;;  %v2470_v37 = vld [vmem:[%s3453_s3 + $0x270] ss:$28 sps:$4 sm:$0xff]   ;;  %v2481_v40 = vld [vmem:[%s3453_s3 + $0x5bc] ss:$28 sps:$4 sm:$0xff]  }
  0xd4   :  { %v2473_v38 = vld [vmem:[%s3453_s3 + $0x5f0] ss:$28 sps:$4 sm:$0xff]   ;;  %v2476_v41 = vld [vmem:[%s3453_s3 + $0x238] ss:$28 sps:$4 sm:$0xff]   ;;  %v2484_v44 = vld [vmem:[%s3453_s3 + $0x204] ss:$28 sps:$4 sm:$0xff]  }
  0xd5   :  { %1666 = vmatprep.mubr.bf16.mxu0 %v2928_v45  ;;  %1707 = vmatprep.mubr.bf16.mxu1 %v2930_v46  ;;  %v2479_v43 = vld [vmem:[%s3453_s3 + $0x5b8] ss:$28 sps:$4 sm:$0xff]  }
  0xd6   :  { %1667 = vmatmul.mubr.bf16.vlgmr.msra.gmra.mxu0 %v2938_v49  ;;  %1708 = vmatmul.mubr.bf16.vlgmr.msra.gmra.mxu1 %v2926_v42 }
  0xd7   :  { %1717 = vmatpush1.bf16.msra.mxu0 %v2398_v47  ;;  %1758 = vmatpush1.bf16.msra.mxu1 %v2401_v48  ;;  %v2487_v47 = vld [vmem:[%s3453_s3 + $0x584] ss:$28 sps:$4 sm:$0xff]  }
  0xd8   :  { %1748 = vmatprep.mubr.bf16.mxu0 %v2928_v45  ;;  %1789 = vmatprep.mubr.bf16.mxu1 %v2930_v46  ;;  %v2482_v48 = vld [vmem:[%s3453_s3 + $0x200] ss:$28 sps:$4 sm:$0xff]  }
  0xd9   :  { %1718 = vmatprep.subr.bf16.mxu0 %v2406_v50  ;;  %1759 = vmatprep.subr.bf16.mxu1 %v2409_v51  ;;  %v2485_v50 = vld [vmem:[%s3453_s3 + $0x580] ss:$28 sps:$4 sm:$0xff]   ;;  %v2490_v51 = vld [vmem:[%s3453_s3 + $0x1cc] ss:$28 sps:$4 sm:$0xff]  }
  0xdb   :  { %1719 = vmatpush1.bf16.msra.mxu0 %v2404_v52  ;;  %1760 = vmatpush1.bf16.msra.mxu1 %v2407_v53  ;;  %v2493_v52 = vld [vmem:[%s3453_s3 + $0x54c] ss:$28 sps:$4 sm:$0xff]  }
  0xdc   :  { %1720 = vmatprep.subr.bf16.mxu0 %v2412_v54  ;;  %1761 = vmatprep.subr.bf16.mxu1 %v2415_v55  ;;  %v2488_v53 = vld [vmem:[%s3453_s3 + $0x1c8] ss:$28 sps:$4 sm:$0xff]   ;;  %v2496_v55 = vld [vmem:[%s3453_s3 + $0x19c] ss:$28 sps:$4 sm:$0xff]  }
  0xdd   :  { %v2491_v54 = vld [vmem:[%s3453_s3 + $0x548] ss:$28 sps:$4 sm:$0xff]  }
  0xdf   :  { %1721 = vmatpush1.bf16.msra.mxu0 %v2410_v56  ;;  %1762 = vmatpush1.bf16.msra.mxu1 %v2413_v57  ;;  %v2499_v56 = vld [vmem:[%s3453_s3 + $0x51c] ss:$28 sps:$4 sm:$0xff]  }
  0xe0   :  { %1722 = vmatprep.subr.bf16.mxu0 %v2418_v58  ;;  %1763 = vmatprep.subr.bf16.mxu1 %v2421_v59  ;;  %v2494_v57 = vld [vmem:[%s3453_s3 + $0x198] ss:$28 sps:$4 sm:$0xff]   ;;  %v2502_v59 = vld [vmem:[%s3453_s3 + $0x164] ss:$28 sps:$4 sm:$0xff]  }
  0xe1   :  { %v2497_v58 = vld [vmem:[%s3453_s3 + $0x518] ss:$28 sps:$4 sm:$0xff]  }
  0xe3   :  { %1723 = vmatpush1.bf16.msra.mxu0 %v2416_v60  ;;  %1764 = vmatpush1.bf16.msra.mxu1 %v2419_v61  ;;  %v2505_v60 = vld [vmem:[%s3453_s3 + $0x4e4] ss:$28 sps:$4 sm:$0xff]  }
  0xe4   :  { %1724 = vmatprep.subr.bf16.mxu0 %v2424_v62  ;;  %1765 = vmatprep.subr.bf16.mxu1 %v2427_v63  ;;  %v2500_v61 = vld [vmem:[%s3453_s3 + $0x160] ss:$28 sps:$4 sm:$0xff]   ;;  %v2508_v63 = vld [vmem:[%s3453_s3 + $0x12c] ss:$28 sps:$4 sm:$0xff]  }
  0xe5   :  { %v2503_v62 = vld [vmem:[%s3453_s3 + $0x4e0] ss:$28 sps:$4 sm:$0xff]  }
  0xe7   :  { %1725 = vmatpush1.bf16.msra.mxu0 %v2422_v0  ;;  %1766 = vmatpush1.bf16.msra.mxu1 %v2425_v1  ;;  %v2511_v0 = vld [vmem:[%s3453_s3 + $0x4ac] ss:$28 sps:$4 sm:$0xff]  }
  0xe8   :  { %1726 = vmatprep.subr.bf16.mxu0 %v2430_v2  ;;  %1767 = vmatprep.subr.bf16.mxu1 %v2433_v3  ;;  %v2506_v1 = vld [vmem:[%s3453_s3 + $0x128] ss:$28 sps:$4 sm:$0xff]   ;;  %v2514_v3 = vld [vmem:[%s3453_s3 + $0xf4] ss:$28 sps:$4 sm:$0xff]  }
  0xe9   :  { %v2509_v2 = vld [vmem:[%s3453_s3 + $0x4a8] ss:$28 sps:$4 sm:$0xff]  }
  0xeb   :  { %1727 = vmatpush1.bf16.msra.mxu0 %v2428_v4  ;;  %1768 = vmatpush1.bf16.msra.mxu1 %v2431_v5  ;;  %v2517_v4 = vld [vmem:[%s3453_s3 + $0x474] ss:$28 sps:$4 sm:$0xff]  }
  0xec   :  { %1728 = vmatprep.subr.bf16.mxu0 %v2436_v6  ;;  %1769 = vmatprep.subr.bf16.mxu1 %v2439_v7  ;;  %v2512_v5 = vld [vmem:[%s3453_s3 + $0xf0] ss:$28 sps:$4 sm:$0xff]   ;;  %v2520_v7 = vld [vmem:[%s3453_s3 + $0xbc] ss:$28 sps:$4 sm:$0xff]  }
  0xed   :  { %v2515_v6 = vld [vmem:[%s3453_s3 + $0x470] ss:$28 sps:$4 sm:$0xff]  }
  0xef   :  { %1729 = vmatpush1.bf16.msra.mxu0 %v2434_v8  ;;  %1770 = vmatpush1.bf16.msra.mxu1 %v2437_v9  ;;  %v2523_v8 = vld [vmem:[%s3453_s3 + $0x43c] ss:$28 sps:$4 sm:$0xff]  }
  0xf0   :  { %1730 = vmatprep.subr.bf16.mxu0 %v2442_v10  ;;  %1771 = vmatprep.subr.bf16.mxu1 %v2445_v11  ;;  %v2518_v9 = vld [vmem:[%s3453_s3 + $0xb8] ss:$28 sps:$4 sm:$0xff]   ;;  %v2526_v11 = vld [vmem:[%s3453_s3 + $0x84] ss:$28 sps:$4 sm:$0xff]  }
  0xf1   :  { %v2521_v10 = vld [vmem:[%s3453_s3 + $0x438] ss:$28 sps:$4 sm:$0xff]  }
  0xf3   :  { %1731 = vmatpush1.bf16.msra.mxu0 %v2440_v12  ;;  %1772 = vmatpush1.bf16.msra.mxu1 %v2443_v13  ;;  %v2529_v12 = vld [vmem:[%s3453_s3 + $0x404] ss:$28 sps:$4 sm:$0xff]  }
  0xf4   :  { %1732 = vmatprep.subr.bf16.mxu0 %v2448_v14  ;;  %1773 = vmatprep.subr.bf16.mxu1 %v2451_v15  ;;  %v2524_v13 = vld [vmem:[%s3453_s3 + $0x80] ss:$28 sps:$4 sm:$0xff]   ;;  %v2532_v15 = vld [vmem:[%s3453_s3 + $0x4c] ss:$28 sps:$4 sm:$0xff]  }
  0xf5   :  { %v2527_v14 = vld [vmem:[%s3453_s3 + $0x400] ss:$28 sps:$4 sm:$0xff]  }
  0xf7   :  { %1733 = vmatpush2.bf16.msra.mxu0 %v2446_v16  ;;  %1774 = vmatpush2.bf16.msra.mxu1 %v2449_v17  ;;  %v2535_v16 = vld [vmem:[%s3453_s3 + $0x3cc] ss:$28 sps:$4 sm:$0xff]  }
  0xf8   :  { %1734 = vmatprep.subr.bf16.mxu0 %v2454_v21  ;;  %1775 = vmatprep.subr.bf16.mxu1 %v2457_v24  ;;  %v2530_v17 = vld [vmem:[%s3453_s3 + $0x48] ss:$28 sps:$4 sm:$0xff]   ;;  %v2538_v24 = vld [vmem:[%s3453_s3 + $0x14] ss:$28 sps:$4 sm:$0xff]  }
  0xf9   :  { %v2533_v21 = vld [vmem:[%s3453_s3 + $0x3c8] ss:$28 sps:$4 sm:$0xff]  }
  0xfb   :  { %1735 = vmatpush2.bf16.msra.mxu0 %v2452_v25  ;;  %1776 = vmatpush2.bf16.msra.mxu1 %v2455_v26  ;;  %v2541_v25 = vld [vmem:[%s3453_s3 + $0x394] ss:$28 sps:$4 sm:$0xff]  }
  0xfc   :  { %1736 = vmatprep.subr.bf16.mxu0 %v2460_v27  ;;  %1777 = vmatprep.subr.bf16.mxu1 %v2463_v28  ;;  %v2536_v26 = vld [vmem:[%s3453_s3 + $0x10] ss:$28 sps:$4 sm:$0xff]   ;;  %v2544_v28 = vld [vmem:[%s3453_s3 + $0x35c] ss:$28 sps:$4 sm:$0xff]  }
  0xfd   :  { %v2539_v27 = vld [vmem:[%s3453_s3 + $0x390] ss:$28 sps:$4 sm:$0xff]  }
  0xff   :  { %1737 = vmatpush2.bf16.msra.mxu0 %v2458_v29  ;;  %1778 = vmatpush2.bf16.msra.mxu1 %v2461_v30  ;;  %v2547_v29 = vld [vmem:[%s3453_s3 + $0x6dc] ss:$28 sps:$4 sm:$0xff]  }
 0x100   :  { %1738 = vmatprep.subr.bf16.mxu0 %v2466_v31  ;;  %1779 = vmatprep.subr.bf16.mxu1 %v2469_v32  ;;  %v2542_v30 = vld [vmem:[%s3453_s3 + $0x358] ss:$28 sps:$4 sm:$0xff]   ;;  %v2550_v32 = vld [vmem:[%s3453_s3 + $0x324] ss:$28 sps:$4 sm:$0xff]  }
 0x101   :  { %v2545_v31 = vld [vmem:[%s3453_s3 + $0x6d8] ss:$28 sps:$4 sm:$0xff]  }
 0x103   :  { %1739 = vmatpush2.bf16.msra.mxu0 %v2464_v33  ;;  %1780 = vmatpush2.bf16.msra.mxu1 %v2467_v34  ;;  %v2553_v33 = vld [vmem:[%s3453_s3 + $0x6a4] ss:$28 sps:$4 sm:$0xff]  }
 0x104   :  { %1740 = vmatprep.subr.bf16.mxu0 %v2472_v35  ;;  %1781 = vmatprep.subr.bf16.mxu1 %v2475_v36  ;;  %v2548_v34 = vld [vmem:[%s3453_s3 + $0x320] ss:$28 sps:$4 sm:$0xff]   ;;  %v2556_v36 = vld [vmem:[%s3453_s3 + $0x2ec] ss:$28 sps:$4 sm:$0xff]  }
 0x105   :  { %v2551_v35 = vld [vmem:[%s3453_s3 + $0x6a0] ss:$28 sps:$4 sm:$0xff]  }
 0x107   :  { %1741 = vmatpush2.bf16.msra.mxu0 %v2470_v37  ;;  %1782 = vmatpush2.bf16.msra.mxu1 %v2473_v38  ;;  %v2559_v37 = vld [vmem:[%s3453_s3 + $0x66c] ss:$28 sps:$4 sm:$0xff]  }
 0x108   :  { %1742 = vmatprep.subr.bf16.mxu0 %v2478_v39  ;;  %1783 = vmatprep.subr.bf16.mxu1 %v2481_v40  ;;  %v2554_v38 = vld [vmem:[%s3453_s3 + $0x2e8] ss:$28 sps:$4 sm:$0xff]   ;;  %v2562_v40 = vld [vmem:[%s3453_s3 + $0x2b4] ss:$28 sps:$4 sm:$0xff]  }
 0x109   :  { %v2557_v39 = vld [vmem:[%s3453_s3 + $0x668] ss:$28 sps:$4 sm:$0xff]  }
 0x10b   :  { %1743 = vmatpush2.bf16.msra.mxu0 %v2476_v41  ;;  %1784 = vmatpush2.bf16.msra.mxu1 %v2479_v43  ;;  %v2565_v41 = vld [vmem:[%s3453_s3 + $0x634] ss:$28 sps:$4 sm:$0xff]  }
 0x10c   :  { %1744 = vmatprep.subr.bf16.mxu0 %v2484_v44  ;;  %1785 = vmatprep.subr.bf16.mxu1 %v2487_v47  ;;  %v2560_v43 = vld [vmem:[%s3453_s3 + $0x2b0] ss:$28 sps:$4 sm:$0xff]   ;;  %v2568_v47 = vld [vmem:[%s3453_s3 + $0x27c] ss:$28 sps:$4 sm:$0xff]  }
 0x10d   :  { %v2563_v44 = vld [vmem:[%s3453_s3 + $0x630] ss:$28 sps:$4 sm:$0xff]  }
 0x10f   :  { %1745 = vmatpush2.bf16.msra.mxu0 %v2482_v48  ;;  %1786 = vmatpush2.bf16.msra.mxu1 %v2485_v50  ;;  %v2571_v48 = vld [vmem:[%s3453_s3 + $0x5fc] ss:$28 sps:$4 sm:$0xff]  }
 0x110   :  { %1746 = vmatprep.subr.bf16.mxu0 %v2490_v51  ;;  %1787 = vmatprep.subr.bf16.mxu1 %v2493_v52  ;;  %v2566_v50 = vld [vmem:[%s3453_s3 + $0x278] ss:$28 sps:$4 sm:$0xff]   ;;  %v2574_v52 = vld [vmem:[%s3453_s3 + $0x244] ss:$28 sps:$4 sm:$0xff]  }
 0x111   :  { %v2569_v51 = vld [vmem:[%s3453_s3 + $0x5f8] ss:$28 sps:$4 sm:$0xff]  }
 0x113   :  { %1747 = vmatpush2.bf16.msra.mxu0 %v2488_v53  ;;  %1788 = vmatpush2.bf16.msra.mxu1 %v2491_v54  ;;  %v2577_v53 = vld [vmem:[%s3453_s3 + $0x5c4] ss:$28 sps:$4 sm:$0xff]  }
 0x114   :  { %1798 = vmatprep.subr.bf16.mxu0 %v2496_v55  ;;  %1839 = vmatprep.subr.bf16.mxu1 %v2499_v56  ;;  %v2572_v54 = vld [vmem:[%s3453_s3 + $0x240] ss:$28 sps:$4 sm:$0xff]   ;;  %v2580_v56 = vld [vmem:[%s3453_s3 + $0x20c] ss:$28 sps:$4 sm:$0xff]  }
 0x115   :  { %v2575_v55 = vld [vmem:[%s3453_s3 + $0x5c0] ss:$28 sps:$4 sm:$0xff]  }
 0x116   :  { %1749 = vmatmul.mubr.bf16.vlgmr.msra.gmra.mxu0 %v2938_v49  ;;  %1790 = vmatmul.mubr.bf16.vlgmr.msra.gmra.mxu1 %v2926_v42 }
 0x117   :  { %1799 = vmatpush1.bf16.msra.mxu0 %v2494_v57  ;;  %1830 = vmatprep.mubr.bf16.mxu0 %v2928_v45  ;;  %v2583_v57 = vld [vmem:[%s3453_s3 + $0x58c] ss:$28 sps:$4 sm:$0xff]  }
 0x118   :  { %1840 = vmatpush1.bf16.msra.mxu1 %v2497_v58  ;;  %1871 = vmatprep.mubr.bf16.mxu1 %v2930_v46  ;;  %v2578_v58 = vld [vmem:[%s3453_s3 + $0x208] ss:$28 sps:$4 sm:$0xff]  }
 0x119   :  { %1800 = vmatprep.subr.bf16.mxu0 %v2502_v59  ;;  %1841 = vmatprep.subr.bf16.mxu1 %v2505_v60  ;;  %v2581_v59 = vld [vmem:[%s3453_s3 + $0x588] ss:$28 sps:$4 sm:$0xff]   ;;  %v2586_v60 = vld [vmem:[%s3453_s3 + $0x1d4] ss:$28 sps:$4 sm:$0xff]  }
 0x11b   :  { %1801 = vmatpush1.bf16.msra.mxu0 %v2500_v61  ;;  %v2589_v61 = vld [vmem:[%s3453_s3 + $0x554] ss:$28 sps:$4 sm:$0xff]  }
 0x11c   :  { %1842 = vmatpush1.bf16.msra.mxu1 %v2503_v62  ;;  %1802 = vmatprep.subr.bf16.mxu0 %v2508_v63  ;;  %v2584_v62 = vld [vmem:[%s3453_s3 + $0x1d0] ss:$28 sps:$4 sm:$0xff]  }
 0x11d   :  { %1843 = vmatprep.subr.bf16.mxu1 %v2511_v0  ;;  %v2587_v63 = vld [vmem:[%s3453_s3 + $0x550] ss:$28 sps:$4 sm:$0xff]   ;;  %v2590_v0 = vld [vmem:[%s3453_s3 + $0x360] ss:$28 sps:$4 sm:$0xff]  }
 0x11f   :  { %1803 = vmatpush1.bf16.msra.mxu0 %v2506_v1  ;;  %v2591_v1 = vld [vmem:[%s3453_s3 + $0x6e0] ss:$28 sps:$4 sm:$0xff]  }
 0x120   :  { %1844 = vmatpush1.bf16.msra.mxu1 %v2509_v2  ;;  %1804 = vmatprep.subr.bf16.mxu0 %v2514_v3  ;;  %v2592_v2 = vld [vmem:[%s3453_s3 + $0x1a0] ss:$28 sps:$4 sm:$0xff]  }
 0x121   :  { %1845 = vmatprep.subr.bf16.mxu1 %v2517_v4  ;;  %v2593_v3 = vld [vmem:[%s3453_s3 + $0x520] ss:$28 sps:$4 sm:$0xff]   ;;  %v2594_v4 = vld [vmem:[%s3453_s3 + $0x328] ss:$28 sps:$4 sm:$0xff]  }
 0x123   :  { %1805 = vmatpush1.bf16.msra.mxu0 %v2512_v5  ;;  %v2595_v5 = vld [vmem:[%s3453_s3 + $0x6a8] ss:$28 sps:$4 sm:$0xff]  }
 0x124   :  { %1846 = vmatpush1.bf16.msra.mxu1 %v2515_v6  ;;  %1806 = vmatprep.subr.bf16.mxu0 %v2520_v7  ;;  %v2596_v6 = vld [vmem:[%s3453_s3 + $0x168] ss:$28 sps:$4 sm:$0xff]  }
 0x125   :  { %1847 = vmatprep.subr.bf16.mxu1 %v2523_v8  ;;  %v2597_v7 = vld [vmem:[%s3453_s3 + $0x4e8] ss:$28 sps:$4 sm:$0xff]   ;;  %v2598_v8 = vld [vmem:[%s3453_s3 + $0x2f0] ss:$28 sps:$4 sm:$0xff]  }
 0x127   :  { %1807 = vmatpush1.bf16.msra.mxu0 %v2518_v9  ;;  %v2599_v9 = vld [vmem:[%s3453_s3 + $0x670] ss:$28 sps:$4 sm:$0xff]  }
 0x128   :  { %1848 = vmatpush1.bf16.msra.mxu1 %v2521_v10  ;;  %1808 = vmatprep.subr.bf16.mxu0 %v2526_v11  ;;  %v2601_v10 = vld [vmem:[%s3453_s3 + $0x4b0] ss:$28 sps:$4 sm:$0xff]   ;;  %v2603_v11 = vld [vmem:[%s3453_s3 + $0x638] ss:$28 sps:$4 sm:$0xff]  }
 0x129   :  { %1849 = vmatprep.subr.bf16.mxu1 %v2529_v12  ;;  %v2604_v12 = vld [vmem:[%s3453_s3 + $0xf8] ss:$28 sps:$4 sm:$0xff]  }
 0x12b   :  { %1809 = vmatpush1.bf16.msra.mxu0 %v2524_v13  ;;  %v2605_v13 = vld [vmem:[%s3453_s3 + $0x478] ss:$28 sps:$4 sm:$0xff]  }
 0x12c   :  { %1850 = vmatpush1.bf16.msra.mxu1 %v2527_v14  ;;  %1810 = vmatprep.subr.bf16.mxu0 %v2532_v15  ;;  %v2606_v14 = vld [vmem:[%s3453_s3 + $0x280] ss:$28 sps:$4 sm:$0xff]  }
 0x12d   :  { %1851 = vmatprep.subr.bf16.mxu1 %v2535_v16  ;;  %v2607_v15 = vld [vmem:[%s3453_s3 + $0x600] ss:$28 sps:$4 sm:$0xff]  }
 0x12e   :  { %v2608_v16 = vld [vmem:[%s3453_s3 + $0xc0] ss:$28 sps:$4 sm:$0xff]  }
 0x12f   :  { %1811 = vmatpush1.bf16.msra.mxu0 %v2530_v17  ;;  %v2609_v17 = vld [vmem:[%s3453_s3 + $0x440] ss:$28 sps:$4 sm:$0xff]  }
 0x130   :  { %1852 = vmatpush1.bf16.msra.mxu1 %v2533_v21  ;;  %1812 = vmatprep.subr.bf16.mxu0 %v2538_v24  ;;  %v2610_v21 = vld [vmem:[%s3453_s3 + $0x248] ss:$28 sps:$4 sm:$0xff]  }
 0x131   :  { %1853 = vmatprep.subr.bf16.mxu1 %v2541_v25  ;;  %v2611_v24 = vld [vmem:[%s3453_s3 + $0x5c8] ss:$28 sps:$4 sm:$0xff]  }
 0x132   :  { %v2612_v25 = vld [vmem:[%s3453_s3 + $0x88] ss:$28 sps:$4 sm:$0xff]  }
 0x133   :  { %1813 = vmatpush1.bf16.msra.mxu0 %v2536_v26  ;;  %v2613_v26 = vld [vmem:[%s3453_s3 + $0x408] ss:$28 sps:$4 sm:$0xff]  }
 0x134   :  { %1854 = vmatpush1.bf16.msra.mxu1 %v2539_v27  ;;  %1814 = vmatprep.subr.bf16.mxu0 %v2544_v28  ;;  %v2614_v27 = vld [vmem:[%s3453_s3 + $0x210] ss:$28 sps:$4 sm:$0xff]  }
 0x135   :  { %1855 = vmatprep.subr.bf16.mxu1 %v2547_v29  ;;  %v2615_v28 = vld [vmem:[%s3453_s3 + $0x590] ss:$28 sps:$4 sm:$0xff]  }
 0x136   :  { %v2616_v29 = vld [vmem:[%s3453_s3 + $0x50] ss:$28 sps:$4 sm:$0xff]  }
 0x137   :  { %1815 = vmatpush2.bf16.msra.mxu0 %v2542_v30  ;;  %v2617_v30 = vld [vmem:[%s3453_s3 + $0x3d0] ss:$28 sps:$4 sm:$0xff]  }
 0x138   :  { %1856 = vmatpush2.bf16.msra.mxu1 %v2545_v31  ;;  %1816 = vmatprep.subr.bf16.mxu0 %v2550_v32  ;;  %v2618_v31 = vld [vmem:[%s3453_s3 + $0x1d8] ss:$28 sps:$4 sm:$0xff]  }
 0x139   :  { %1857 = vmatprep.subr.bf16.mxu1 %v2553_v33  ;;  %v2619_v32 = vld [vmem:[%s3453_s3 + $0x558] ss:$28 sps:$4 sm:$0xff]  }
 0x13a   :  { %v2620_v33 = vld [vmem:[%s3453_s3 + $0x18] ss:$28 sps:$4 sm:$0xff]  }
 0x13b   :  { %1817 = vmatpush2.bf16.msra.mxu0 %v2548_v34  ;;  %v2621_v34 = vld [vmem:[%s3453_s3 + $0x398] ss:$28 sps:$4 sm:$0xff]  }
 0x13c   :  { %1858 = vmatpush2.bf16.msra.mxu1 %v2551_v35  ;;  %1818 = vmatprep.subr.bf16.mxu0 %v2556_v36  ;;  %v3427_v35 = vld [vmem:[%s3454_s4] sm:$0x7f] }
 0x13d   :  { %1859 = vmatprep.subr.bf16.mxu1 %v2559_v37  ;;  %v450_v36 = vrot.slane %v3427_v35, %v34_v19  ;;  %v454_v37 = vrot.slane %v3427_v35, %v38_v22 }
 0x13f   :  { %1819 = vmatpush2.bf16.msra.mxu0 %v2554_v38 }
 0x140   :  { %1860 = vmatpush2.bf16.msra.mxu1 %v2557_v39  ;;  %1820 = vmatprep.subr.bf16.mxu0 %v2562_v40 }
 0x141   :  { %1861 = vmatprep.subr.bf16.mxu1 %v2565_v41 }
 0x143   :  { %1821 = vmatpush2.bf16.msra.mxu0 %v2560_v43 }
 0x144   :  { %1862 = vmatpush2.bf16.msra.mxu1 %v2563_v44  ;;  %1822 = vmatprep.subr.bf16.mxu0 %v2568_v47 }
 0x145   :  { %1863 = vmatprep.subr.bf16.mxu1 %v2571_v48 }
 0x147   :  { %1823 = vmatpush2.bf16.msra.mxu0 %v2566_v50 }
 0x148   :  { %1864 = vmatpush2.bf16.msra.mxu1 %v2569_v51  ;;  %1824 = vmatprep.subr.bf16.mxu0 %v2574_v52 }
 0x149   :  { %1865 = vmatprep.subr.bf16.mxu1 %v2577_v53 }
 0x14b   :  { %1825 = vmatpush2.bf16.msra.mxu0 %v2572_v54 }
 0x14c   :  { %1866 = vmatpush2.bf16.msra.mxu1 %v2575_v55  ;;  %1826 = vmatprep.subr.bf16.mxu0 %v2580_v56 }
 0x14d   :  { %1867 = vmatprep.subr.bf16.mxu1 %v2583_v57 }
 0x14f   :  { %1827 = vmatpush2.bf16.msra.mxu0 %v2578_v58  ;;  %v458_v58 = vrot.slane %v3427_v35, %v42_v20 }
 0x150   :  { %1868 = vmatpush2.bf16.msra.mxu1 %v2581_v59  ;;  %1828 = vmatprep.subr.bf16.mxu0 %v2586_v60  ;;  %v462_v59 = vrot.slane %v3427_v35, %v46_v23 }
 0x151   :  { %1869 = vmatprep.subr.bf16.mxu1 %v2589_v61 }
 0x153   :  { %1829 = vmatpush2.bf16.msra.mxu0 %v2584_v62 }
 0x154   :  { %1870 = vmatpush2.bf16.msra.mxu1 %v2587_v63  ;;  %2246 = vmatprep.subr.bf16.mxu0 %v2590_v0 }
 0x155   :  { %2268 = vmatprep.subr.bf16.mxu1 %v2591_v1 }
 0x156   :  { %1831 = vmatmul.mubr.bf16.vlgmr.msra.gmra.mxu0 %v2938_v49 }
 0x157   :  { %1872 = vmatmul.mubr.bf16.vlgmr.msra.gmra.mxu1 %v2926_v42  ;;  %2247 = vmatpush3.bf16.msra.mxu0 %v2592_v2 }
 0x158   :  { %1912 = vmatprep.mubr.bf16.mxu0 %v2928_v45  ;;  %2269 = vmatpush3.bf16.msra.mxu1 %v2593_v3  ;;  %v2600_v45 = vld [vmem:[%s3453_s3 + $0x130] ss:$28 sps:$4 sm:$0xff]  }
 0x159   :  { %1952 = vmatprep.mubr.bf16.mxu1 %v2930_v46  ;;  %2248 = vmatprep.subr.bf16.mxu0 %v2594_v4  ;;  %v2602_v46 = vld [vmem:[%s3453_s3 + $0x2b8] ss:$28 sps:$4 sm:$0xff]   ;;  %s2659_s3 = smov [#allocation2]  }
 0x15a   :  { %2270 = vmatprep.subr.bf16.mxu1 %v2595_v5  ;;  %s2002_s4 = sshll.u32 %s2659_s3, 4  ;;  %s2003_s4 = int_to_ptr.vmem [resolvable:$true] %s2002_s4 }
 0x15b   :  { %2249 = vmatpush3.bf16.msra.mxu0 %v2596_v6  ;;  %s2636_s13 = scalar_lea.vmem %s2003_s4, 896  ;;  %p2641_p1 = scmp.lt.s32.totalorder %s2003_s4, %s2003_s4 }
 0x15c   :  { %2271 = vmatpush3.bf16.msra.mxu1 %v2597_v7  ;;  %2250 = vmatprep.subr.bf16.mxu0 %v2598_v8  ;;  %p2637_p0 = scmp.ne.s32.totalorder %s2003_s4, %s2636_s13  ;;  %p2642_p2 = scmp.lt.s32.totalorder %s2636_s13, %s2636_s13 }
 0x15d   :  { %2272 = vmatprep.subr.bf16.mxu1 %v2599_v9 }
 0x15e   :  { %p2643_p3 = por %p2642_p2, %p2641_p1 }
 0x15f   :  { %2251 = vmatpush3.bf16.msra.mxu0 %v2600_v45 }
 0x160   :  { %2273 = vmatpush3.bf16.msra.mxu1 %v2601_v10  ;;  %2252 = vmatprep.subr.bf16.mxu0 %v2602_v46  ;;  %p2644_p4 = pnand %p2643_p3, %p2637_p0 }
 0x161   :  { %2274 = vmatprep.subr.bf16.mxu1 %v2603_v11 }
 0x163   :  { %2253 = vmatpush3.bf16.msra.mxu0 %v2604_v12  ;;  %v465_v12 = vsub.s32 4, %v2909_v18 }
 0x164   :  { %2275 = vmatpush3.bf16.msra.mxu1 %v2605_v13  ;;  %2254 = vmatprep.subr.bf16.mxu0 %v2606_v14  ;;  %v469_v13 = vsub.s32 5, %v2909_v18 }
 0x165   :  { %2276 = vmatprep.subr.bf16.mxu1 %v2607_v15  ;;  %v466_v14 = vrot.slane %v3427_v35, %v465_v12 }
 0x166   :  { %v470_v15 = vrot.slane %v3427_v35, %v469_v13 }
 0x167   :  { %2255 = vmatpush3.bf16.msra.mxu0 %v2608_v16 }
 0x168   :  { %2277 = vmatpush3.bf16.msra.mxu1 %v2609_v17  ;;  %2256 = vmatprep.subr.bf16.mxu0 %v2610_v21 }
 0x169   :  { %2278 = vmatprep.subr.bf16.mxu1 %v2611_v24 }
 0x16b   :  { %2257 = vmatpush3.bf16.msra.mxu0 %v2612_v25 }
 0x16c   :  { %2279 = vmatpush3.bf16.msra.mxu1 %v2613_v26  ;;  %2258 = vmatprep.subr.bf16.mxu0 %v2614_v27 }
 0x16d   :  { %2280 = vmatprep.subr.bf16.mxu1 %v2615_v28 }
 0x16f   :  { %2259 = vmatpush3.bf16.msra.mxu0 %v2616_v29 }
 0x170   :  { %2281 = vmatpush3.bf16.msra.mxu1 %v2617_v30  ;;  %2260 = vmatprep.subr.bf16.mxu0 %v2618_v31 }
 0x171   :  { %2282 = vmatprep.subr.bf16.mxu1 %v2619_v32 }
 0x173   :  { %2261 = vmatpush3.bf16.msra.mxu0 %v2620_v33 }
 0x174   :  { %2283 = vmatpush3.bf16.msra.mxu1 %v2621_v34 }
 0x176   :  { %1913 = vmatmul.mubr.bf16.vlgmr.msra.gmra.mxu0 %v2938_v49 }
 0x177   :  { %1953 = vmatmul.mubr.bf16.vlgmr.msra.gmra.mxu1 %v2926_v42 }
 0x196   :  { %v1668_v38 = vpop.f32.mrf.mxu0  ;;  %v1709_v39 = vpop.f32.mrf.mxu1 }
 0x197   :  { %v1669_v40 = vadd.f32 %v1668_v38, %v450_v36 }
 0x198   :  { %v1670_v41 = vpop.f32.mrf.mxu0  ;;  %v1711_v49 = vpop.f32.mrf.mxu1 }
 0x199   :  { %v1710_v43 = vadd.f32 %v1709_v39, %v1669_v40  ;;  %v1671_v42 = vadd.f32 %v1670_v41, %v454_v37 }
 0x19a   :  { %v1672_v44 = vpop.f32.mrf.mxu0  ;;  %v1713_v47 = vpop.f32.mrf.mxu1 }
 0x19b   :  { %v1960_v48 = vmul.f32 0.5, %v1710_v43  ;;  %v1712_v50 = vadd.f32 %v1711_v49, %v1671_v42  ;;  %v473_v49 = vsub.s32 6, %v2909_v18 }
 0x19c   :  { %v1673_v51 = vpop.f32.mrf.mxu0  ;;  %v1714_v52 = vpop.f32.mrf.mxu1 }
 0x19d   :  { %2622 = vtanh.f32 %v1960_v48  ;;  %v1961_v53 = vmul.f32 0.5, %v1712_v50  ;;  %v474_v44 = vrot.slane %v3427_v35, %v473_v49 }
 0x19f   :  { %2624 = vtanh.f32 %v1961_v53 }
 0x1aa   :  { %v2623_v19 = vpop.eup %2622 }
 0x1ab   :  { %v1974_v54 = vadd.f32 1.0, %v2623_v19 }
 0x1ac   :  { %v2625_v55 = vpop.eup %2624 }
 0x1ad   :  { %v1981_v22 = vmul.f32 0.5, %v1974_v54  ;;  %v1975_v56 = vadd.f32 1.0, %v2625_v55 }
 0x1af   :  { %1988 = vst [vmem:[#allocation2] sm:$0xff] %v1981_v22  ;;  %v1982_v57 = vmul.f32 0.5, %v1975_v56 }
 0x1b1   :  { %1989 = vst [vmem:[#allocation2 + $0x8] sm:$0xff] %v1982_v57 }
 0x1d6   :  { %v1750_v60 = vpop.f32.mrf.mxu0  ;;  %v1791_v61 = vpop.f32.mrf.mxu1 }
 0x1d7   :  { %v1751_v62 = vadd.f32 %v1750_v60, %v458_v58 }
 0x1d8   :  { %v1752_v63 = vpop.f32.mrf.mxu0  ;;  %v1793_v0 = vpop.f32.mrf.mxu1 }
 0x1d9   :  { %v1792_v1 = vadd.f32 %v1791_v61, %v1751_v62  ;;  %v1753_v2 = vadd.f32 %v1752_v63, %v462_v59 }
 0x1da   :  { %v1754_v3 = vpop.f32.mrf.mxu0  ;;  %v1795_v4 = vpop.f32.mrf.mxu1 }
 0x1db   :  { %v1962_v5 = vmul.f32 0.5, %v1792_v1  ;;  %v1794_v6 = vadd.f32 %v1793_v0, %v1753_v2 }
 0x1dc   :  { %v1755_v7 = vpop.f32.mrf.mxu0  ;;  %v1796_v8 = vpop.f32.mrf.mxu1 }
 0x1dd   :  { %2626 = vtanh.f32 %v1962_v5  ;;  %v1963_v9 = vmul.f32 0.5, %v1794_v6 }
 0x1df   :  { %2628 = vtanh.f32 %v1963_v9 }
 0x1ea   :  { %v2627_v20 = vpop.eup %2626 }
 0x1eb   :  { %v1976_v45 = vadd.f32 1.0, %v2627_v20 }
 0x1ec   :  { %v2629_v10 = vpop.eup %2628 }
 0x1ed   :  { %v1983_v23 = vmul.f32 0.5, %v1976_v45  ;;  %v1977_v46 = vadd.f32 1.0, %v2629_v10 }
 0x1ef   :  { %1990 = vst [vmem:[#allocation2 + $0x10] sm:$0xff] %v1983_v23  ;;  %v1984_v11 = vmul.f32 0.5, %v1977_v46 }
 0x1f1   :  { %1991 = vst [vmem:[#allocation2 + $0x18] sm:$0xff] %v1984_v11 }
 0x216   :  { %v1832_v16 = vpop.f32.mrf.mxu0 }
 0x217   :  { %v1833_v17 = vadd.f32 %v1832_v16, %v466_v14  ;;  %v1873_v21 = vpop.f32.mrf.mxu1 }
 0x218   :  { %v1834_v24 = vpop.f32.mrf.mxu0 }
 0x219   :  { %v1874_v25 = vadd.f32 %v1873_v21, %v1833_v17  ;;  %v1835_v26 = vadd.f32 %v1834_v24, %v470_v15  ;;  %v1875_v27 = vpop.f32.mrf.mxu1 }
 0x21a   :  { %v1836_v28 = vpop.f32.mrf.mxu0 }
 0x21b   :  { %v1964_v29 = vmul.f32 0.5, %v1874_v25  ;;  %v1876_v30 = vadd.f32 %v1875_v27, %v1835_v26  ;;  %v1877_v31 = vpop.f32.mrf.mxu1 }
 0x21c   :  { %v1837_v32 = vpop.f32.mrf.mxu0 }
 0x21d   :  { %2630 = vtanh.f32 %v1964_v29  ;;  %v1965_v33 = vmul.f32 0.5, %v1876_v30  ;;  %v1878_v34 = vpop.f32.mrf.mxu1 }
 0x21f   :  { %2632 = vtanh.f32 %v1965_v33 }
 0x22a   :  { %v2631_v36 = vpop.eup %2630 }
 0x22b   :  { %v1978_v37 = vadd.f32 1.0, %v2631_v36 }
 0x22c   :  { %v2633_v38 = vpop.eup %2632 }
 0x22d   :  { %v1985_v39 = vmul.f32 0.5, %v1978_v37  ;;  %v1979_v40 = vadd.f32 1.0, %v2633_v38 }
 0x22f   :  { %1992 = vst [vmem:[#allocation2 + $0x20] sm:$0xff] %v1985_v39  ;;  %v1986_v41 = vmul.f32 0.5, %v1979_v40 }
 0x231   :  { %1993 = vst [vmem:[#allocation2 + $0x28] sm:$0xff] %v1986_v41 }
 0x236   :  { %v2262_v43 = vpop.f32.mrf.mxu0 }
 0x237   :  { %v2284_v42 = vpop.f32.mrf.mxu1 }
 0x238   :  { %v2263_v47 = vpop.f32.mrf.mxu0 }
 0x239   :  { %v2264_v48 = vadd.f32 %v2263_v47, %v2262_v43  ;;  %v2285_v50 = vpop.f32.mrf.mxu1 }
 0x23a   :  { %v2265_v51 = vpop.f32.mrf.mxu0  ;;  %v2286_v53 = vadd.f32 %v2285_v50, %v2284_v42 }
 0x23b   :  { %v1915_v52 = vadd.f32 %v2264_v48, %v474_v44  ;;  %v2287_v19 = vpop.f32.mrf.mxu1 }
 0x23c   :  { %v2266_v54 = vpop.f32.mrf.mxu0 }
 0x23d   :  { %v1955_v55 = vadd.f32 %v2286_v53, %v1915_v52  ;;  %v2288_v22 = vpop.f32.mrf.mxu1 }
 0x23f   :  { %v1966_v56 = vmul.f32 0.5, %v1955_v55 }
 0x241   :  { %2634 = vtanh.f32 %v1966_v56 }
 0x24e   :  { %v2635_v57 = vpop.eup %2634 }
 0x24f   :  { %v1980_v18 = vadd.f32 1.0, %v2635_v57 }
 0x251   :  { %v1987_v58 = vmul.f32 0.5, %v1980_v18 }
 0x253   :  { %1995 = vst.msk [vmem:[#allocation2 + $0x30] sm:$0xff] %vm1994_vm2, %v1987_v58 }
 0x254   :  { %2647 = shalt.err (!%p2644_p4)
}
 0x255   :  { %2005 = dma.vmem_to_hbm [thread:$0]  %s2003_s4, 896, %s3455_s5, [#allocation3]  }
 0x256   :  { %2656 = dma.done.wait [#allocation3], 896  }
 0x257   :  { %2657 = vsyncadd [#allocation3], 4294966400 }
 0x258   :  { %2009 = vsyncpa [#allocation3], 1 }

</bundles_post_ra>
